<compile_context>
chip_gen: v7x
topology: tpu7x:2x2x1
jax: 0.10.0
libtpu: 0.0.40
codegen_flags: <defaults>
</compile_context>

<pallas_src>
import jax
import jax.numpy as jnp
from jax.experimental import pallas as pl
from jax.experimental.pallas import tpu as pltpu

PACK_DIM = 72  # common padded width for all folded layers (multiple of 8 sublanes)


def _round_up(n, m):
    return ((n + m - 1) // m) * m


def policy_kernel(x_ref, w_ref, out_ref):
    # x_ref: (TB, 72) = [state(4) | 1 | zeros(67)]; the ones column carries the
    # biases through every layer (ReLU(1) == 1), zero columns stay zero.
    # w_ref: (4, 72, 72) packed, zero-padded, bias-folded weights.
    x = x_ref[...]
    h = jnp.maximum(
        jnp.dot(x, w_ref[0], preferred_element_type=jnp.float32), 0.0)      # (TB, 72)
    h = jnp.maximum(
        jnp.dot(h, w_ref[1], preferred_element_type=jnp.float32), 0.0)      # (TB, 72)
    h = jnp.maximum(
        jnp.dot(h, w_ref[2], preferred_element_type=jnp.float32), 0.0)      # (TB, 72)
    # 2-class head folded to one column: p1 = sigmoid(z1 - z0), p0 = 1 - p1.
    z = jnp.dot(h, w_ref[3], preferred_element_type=jnp.float32)[:, 0:1]    # (TB, 1)
    p1 = pl.reciprocal(1.0 + jnp.exp(-z), approx=True)                      # EUP sigmoid
    out_ref[...] = jnp.concatenate([1.0 - p1, p1], axis=-1)                 # single store


def fold_and_pack_params(params):
    """Fold biases into weights, collapse the 2-class head, pack into (4,72,72).

    Do this once (outside the RL hot loop) and reuse the packed tensor.
    """
    w1, b1, w2, b2, w3, b3, w4, b4 = params

    def aug(w, b, carry_ones):
        wa = jnp.concatenate([w, b.reshape(1, -1)], axis=0)                 # (K+1, N)
        if carry_ones:
            ones_col = jnp.concatenate(
                [jnp.zeros((w.shape[0], 1), w.dtype),
                 jnp.ones((1, 1), w.dtype)], axis=0)                        # (K+1, 1)
            wa = jnp.concatenate([wa, ones_col], axis=-1)                   # (K+1, N+1)
        return wa

    w1a = aug(w1, b1, True)                               # (5, 65)
    w2a = aug(w2, b2, True)                               # (65, 65)
    w3a = aug(w3, b3, True)                               # (65, 33)
    w4d = w4[:, 1:2] - w4[:, 0:1]                         # (32, 1)
    b4d = (b4[:, 1:2] - b4[:, 0:1]).reshape(1, 1)         # (1, 1)
    w4a = jnp.concatenate([w4d, b4d], axis=0)             # (33, 1)

    def pad_to(w):
        return jnp.pad(w, ((0, PACK_DIM - w.shape[0]), (0, PACK_DIM - w.shape[1])))

    return jnp.stack([pad_to(w) for w in (w1a, w2a, w3a, w4a)])   # (4, 72, 72)


def policy_net_forward(x, w_packed, *, tile_b=None):
    """x: (B, 4) float32 -> probs: (B, 2) float32 (Categorical parameters)."""
    B = x.shape[0]

    # Pad batch to the f32 sublane granularity (8) and to the batch tile.
    if tile_b is None:
        tile_b = min(1024, _round_up(max(B, 8), 8))
    tile_b = _round_up(tile_b, 8)
    Bp = _round_up(max(B, tile_b), tile_b)

    x_aug = jnp.concatenate([x, jnp.ones((B, 1), x.dtype)], axis=-1)        # (B, 5)
    x_pad = jnp.pad(x_aug, ((0, Bp - B), (0, PACK_DIM - 5)))                # (Bp, 72)

    out = pl.pallas_call(
        policy_kernel,
        out_shape=jax.ShapeDtypeStruct((Bp, 2), jnp.float32),
        grid=(Bp // tile_b,),
        in_specs=[
            pl.BlockSpec((tile_b, PACK_DIM), lambda i: (i, 0)),
            # Same block every grid step -> weights are DMA'd once and stay in VMEM.
            pl.BlockSpec(w_packed.shape, lambda i: (0, 0, 0)),
        ],
        out_specs=pl.BlockSpec((tile_b, 2), lambda i: (i, 0)),
        compiler_params=pltpu.CompilerParams(
            dimension_semantics=("parallel",)),   # v7x: batch tiles split across 2 TCs
    )(x_pad, w_packed)
    return out[:B]


def init_params(key):
    """Deterministic init mimicking PyTorch nn.Linear: U(-1/sqrt(fan_in), +1/sqrt(fan_in)).

    Weights are stored as (in_features, out_features) so the math is x @ W.
    Biases are stored as (1, out_features) rows.
    """
    sizes = [(4, 64), (64, 64), (64, 32), (32, 2)]
    params = []
    for (fan_in, fan_out) in sizes:
        key, kw, kb = jax.random.split(key, 3)
        bound = 1.0 / jnp.sqrt(float(fan_in))
        w = jax.random.uniform(kw, (fan_in, fan_out), jnp.float32, -bound, bound)
        b = jax.random.uniform(kb, (1, fan_out), jnp.float32, -bound, bound)
        params.extend([w, b])
    return tuple(params)


if __name__ == "__main__":
    key = jax.random.PRNGKey(0)
    key, kx = jax.random.split(key)
    B = 8  # small batch of CartPole states (state dim = 4)
    x = jax.random.normal(kx, (B, 4), dtype=jnp.float32)

    params = init_params(key)
    w_packed = fold_and_pack_params(params)

    probs = policy_net_forward(x, w_packed)
    probs = jax.block_until_ready(probs)

    # Reference check in plain JAX (original un-folded formulation).
    w1, b1, w2, b2, w3, b3, w4, b4 = params
    h = jnp.maximum(x @ w1 + b1, 0.0)
    h = jnp.maximum(h @ w2 + b2, 0.0)
    h = jnp.maximum(h @ w3 + b3, 0.0)
    ref = jax.nn.softmax(h @ w4 + b4, axis=-1)

    assert probs.shape == (B, 2)
    # p0 = 1 - p1 by construction -> rows sum to 1 (fp rounding only).
    assert jnp.allclose(jnp.sum(probs, axis=-1), 1.0, atol=1e-5)
    # approx=True reciprocal (EUP) trades a few ULPs; compare at a relaxed tol.
    assert jnp.allclose(probs, ref, atol=2e-3, rtol=2e-3)

    print("KERNEL_OK")
</pallas_src>

<mosaic_0001>
module attributes {stable_mosaic.version = 11 : i64} {
  func.func @policy_kernel(%arg0: i32, %arg1: memref<8x72xf32, #tpu.memory_space<vmem>>, %arg2: memref<4x72x72xf32, #tpu.memory_space<vmem>>, %arg3: memref<8x2xf32, #tpu.memory_space<vmem>>) attributes {dimension_semantics = [#tpu.dimension_semantics<parallel>], iteration_bounds = array<i64: 1>, scalar_prefetch = 0 : i64, scratch_operands = 0 : i64, tpu.core_type = #tpu.core_type<tc>, window_params = [{transform_indices = @transform_0, window_bounds = array<i64: 8, 72>}, {pipeline_mode = #tpu.pipeline_mode<synchronous>, transform_indices = @transform_1, window_bounds = array<i64: 4, 72, 72>}, {transform_indices = @transform_2, window_bounds = array<i64: 8, 2>}]} {
    %c0 = arith.constant 0 : index
    %c0_0 = arith.constant 0 : index
    %0 = vector.load %arg1[%c0, %c0_0] : memref<8x72xf32, #tpu.memory_space<vmem>>, vector<8x72xf32>
    %c0_1 = arith.constant 0 : index
    %c0_2 = arith.constant 0 : index
    %c0_3 = arith.constant 0 : index
    %1 = vector.load %arg2[%c0_1, %c0_2, %c0_3] : memref<4x72x72xf32, #tpu.memory_space<vmem>>, vector<1x72x72xf32>
    %2 = vector.shape_cast %1 : vector<1x72x72xf32> to vector<72x72xf32>
    %cst = arith.constant dense<0.000000e+00> : vector<8x72xf32>
    %3 = tpu.matmul %0, %2, %cst {dimension_numbers = #tpu.dot_dimension_numbers<[1], [0], [0], [1], [0, 0, 1, 1], [], []>} : vector<8x72xf32>, vector<72x72xf32>, vector<8x72xf32> -> vector<8x72xf32>
    %cst_4 = arith.constant 0.000000e+00 : f32
    %4 = vector.broadcast %cst_4 : f32 to vector<8x72xf32>
    %5 = arith.maximumf %3, %4 : vector<8x72xf32>
    %c1 = arith.constant 1 : index
    %c0_5 = arith.constant 0 : index
    %c0_6 = arith.constant 0 : index
    %6 = vector.load %arg2[%c1, %c0_5, %c0_6] : memref<4x72x72xf32, #tpu.memory_space<vmem>>, vector<1x72x72xf32>
    %7 = vector.shape_cast %6 : vector<1x72x72xf32> to vector<72x72xf32>
    %cst_7 = arith.constant dense<0.000000e+00> : vector<8x72xf32>
    %8 = tpu.matmul %5, %7, %cst_7 {dimension_numbers = #tpu.dot_dimension_numbers<[1], [0], [0], [1], [0, 0, 1, 1], [], []>} : vector<8x72xf32>, vector<72x72xf32>, vector<8x72xf32> -> vector<8x72xf32>
    %cst_8 = arith.constant 0.000000e+00 : f32
    %9 = vector.broadcast %cst_8 : f32 to vector<8x72xf32>
    %10 = arith.maximumf %8, %9 : vector<8x72xf32>
    %c2 = arith.constant 2 : index
    %c0_9 = arith.constant 0 : index
    %c0_10 = arith.constant 0 : index
    %11 = vector.load %arg2[%c2, %c0_9, %c0_10] : memref<4x72x72xf32, #tpu.memory_space<vmem>>, vector<1x72x72xf32>
    %12 = vector.shape_cast %11 : vector<1x72x72xf32> to vector<72x72xf32>
    %cst_11 = arith.constant dense<0.000000e+00> : vector<8x72xf32>
    %13 = tpu.matmul %10, %12, %cst_11 {dimension_numbers = #tpu.dot_dimension_numbers<[1], [0], [0], [1], [0, 0, 1, 1], [], []>} : vector<8x72xf32>, vector<72x72xf32>, vector<8x72xf32> -> vector<8x72xf32>
    %cst_12 = arith.constant 0.000000e+00 : f32
    %14 = vector.broadcast %cst_12 : f32 to vector<8x72xf32>
    %15 = arith.maximumf %13, %14 : vector<8x72xf32>
    %c3 = arith.constant 3 : index
    %c0_13 = arith.constant 0 : index
    %c0_14 = arith.constant 0 : index
    %16 = vector.load %arg2[%c3, %c0_13, %c0_14] : memref<4x72x72xf32, #tpu.memory_space<vmem>>, vector<1x72x72xf32>
    %17 = vector.shape_cast %16 : vector<1x72x72xf32> to vector<72x72xf32>
    %cst_15 = arith.constant dense<0.000000e+00> : vector<8x72xf32>
    %18 = tpu.matmul %15, %17, %cst_15 {dimension_numbers = #tpu.dot_dimension_numbers<[1], [0], [0], [1], [0, 0, 1, 1], [], []>} : vector<8x72xf32>, vector<72x72xf32>, vector<8x72xf32> -> vector<8x72xf32>
    %19 = vector.extract_strided_slice %18 {offsets = [0, 0], sizes = [8, 1], strides = [1, 1]} : vector<8x72xf32> to vector<8x1xf32>
    %cst_16 = arith.constant 0.000000e+00 : f32
    %20 = vector.broadcast %cst_16 : f32 to vector<8x1xf32>
    %21 = arith.subf %20, %19 : vector<8x1xf32>
    %22 = math.exp %21 : vector<8x1xf32>
    %cst_17 = arith.constant 1.000000e+00 : f32
    %23 = vector.broadcast %cst_17 : f32 to vector<8x1xf32>
    %24 = arith.addf %23, %22 : vector<8x1xf32>
    %25 = tpu.reciprocal %24 {approx = true} : vector<8x1xf32> -> vector<8x1xf32>
    %cst_18 = arith.constant 1.000000e+00 : f32
    %26 = vector.broadcast %cst_18 : f32 to vector<8x1xf32>
    %27 = arith.subf %26, %25 : vector<8x1xf32>
    %28 = tpu.concatenate %27, %25 in 1 : vector<8x1xf32>, vector<8x1xf32> -> vector<8x2xf32>
    %c0_19 = arith.constant 0 : index
    %c0_20 = arith.constant 0 : index
    %29 = vector.load %arg3[%c0_19, %c0_20] : memref<8x2xf32, #tpu.memory_space<vmem>>, vector<8x2xf32>
    tpu.vector_store %arg3[%c0_19, %c0_20], %28 {strides = array<i32>} : memref<8x2xf32, #tpu.memory_space<vmem>>, vector<8x2xf32>,
    return
  }
  func.func @transform_0(%arg0: i32) -> (i32, i32) {
    %c0_i32 = arith.constant 0 : i32
    %c0_i32_0 = arith.constant 0 : i32
    return %arg0, %c0_i32 : i32, i32
  }
  func.func @transform_1(%arg0: i32) -> (i32, i32, i32) {
    %c0_i32 = arith.constant 0 : i32
    %c0_i32_0 = arith.constant 0 : i32
    %c0_i32_1 = arith.constant 0 : i32
    %c0_i32_2 = arith.constant 0 : i32
    return %c0_i32, %c0_i32_0, %c0_i32_1 : i32, i32, i32
  }
  func.func @transform_2(%arg0: i32) -> (i32, i32) {
    %c0_i32 = arith.constant 0 : i32
    %c0_i32_0 = arith.constant 0 : i32
    return %arg0, %c0_i32 : i32, i32
  }
}

</mosaic_0001>

<bundles_post_ra>
// kernel: tpu_custom_call.1
= control target key start
LH: loop header
LB: loop body
LE: loop exit
PB: predicated region body
PF: predicated region fallthrough
CT: control target
= control target key end

     0   :  { %7 = vsyncpa [#allocation3], 0  ;;  %s718_s0 = inlined_call_operand.hbm [shape: f32[8,72], index: 0, kind: input, shape index: {}]   ;;  %s719_s1 = inlined_call_operand.hbm [shape: f32[4,72,72], index: 1, kind: input, shape index: {}]   ;;  %s720_s2 = inlined_call_operand.vmem [shape: f32[8,2], index: 2, kind: output, shape index: {}]  }
   0x1   :  { %8 = vsyncpa [#allocation5], 0  ;;  %s629_s9 = smov [#allocation2]   ;;  %s630_s11 = smov [#allocation4]  }
   0x2   :  { %s15_s10 = sshll.u32 %s629_s9, 4  ;;  %s24_s12 = sshll.u32 %s630_s11, 4  ;;  %s16_s10 = int_to_ptr.vmem [resolvable:$true] %s15_s10  ;;  %s652_s12 = int_to_ptr.vmem [resolvable:$true] %s24_s12 }
   0x3   :  { %s581_s15 = scalar_lea.hbm %s718_s0, 128 }
   0x4   :  { %p582_p0 = scmp.ne.s32.totalorder %s718_s0, %s581_s15  ;;  %p585_p1 = scmp.lt.u32.totalorder %s581_s15, %s718_s0 }
   0x6   :  { %p587_p2 = pnand %p585_p1, %p582_p0 }
   0x8   :  { %590 = shalt.err (!%p587_p2)
}
   0x9   :  { %s591_s20 = scalar_lea.vmem %s16_s10, 128  ;;  %p596_p4 = scmp.lt.s32.totalorder %s16_s10, %s16_s10 }
   0xa   :  { %p592_p3 = scmp.ne.s32.totalorder %s16_s10, %s591_s20  ;;  %p597_p5 = scmp.lt.s32.totalorder %s591_s20, %s591_s20 }
   0xc   :  { %p598_p6 = por %p597_p5, %p596_p4 }
   0xe   :  { %p599_p7 = pnand %p598_p6, %p592_p3 }
  0x10   :  { %602 = shalt.err (!%p599_p7)
}
  0x11   :  { %18 = dma.hbm_to_vmem [thread:$0]  %s718_s0, 128, %s16_s10, [#allocation3]  }
  0x12   :  { %s603_s25 = scalar_lea.hbm %s719_s1, 4608 }
  0x13   :  { %p604_p8 = scmp.ne.s32.totalorder %s719_s1, %s603_s25  ;;  %p607_p9 = scmp.lt.u32.totalorder %s603_s25, %s719_s1 }
  0x15   :  { %p609_p10 = pnand %p607_p9, %p604_p8 }
  0x17   :  { %612 = shalt.err (!%p609_p10)
}
  0x18   :  { %s613_s30 = scalar_lea.vmem %s652_s12, 4608  ;;  %p618_p12 = scmp.lt.s32.totalorder %s652_s12, %s652_s12 }
  0x19   :  { %p614_p11 = scmp.ne.s32.totalorder %s652_s12, %s613_s30  ;;  %p619_p13 = scmp.lt.s32.totalorder %s613_s30, %s613_s30 }
  0x1b   :  { %p620_p0 = por %p619_p13, %p618_p12 }
  0x1d   :  { %p621_p1 = pnand %p620_p0, %p614_p11 }
  0x1f   :  { %624 = shalt.err (!%p621_p1)
}
  0x20   :  { %s631_s0 = smov 128   ;;  %s632_s3 = smov 8  }
  0x21   :  { %30 = dma.hbm_to_vmem [thread:$0]  %s719_s1, 4608, %s652_s12, [#allocation5], %s631_s0, %s631_s0, %s632_s3  }
  0x22   :  { %625 = dma.done.wait [#allocation3], 128  }
  0x23   :  { %626 = vsyncadd [#allocation3], 4294967168 }
  0x24   :  { %627 = dma.done.wait [#allocation5], 4608  }
  0x25   :  { %628 = vsyncadd [#allocation5], 4294962688  ;;  %v633_v0 = vmov 0.0|0.0   ;;  %vm634_vm0 = vmmov 0   ;;  %v635_v1 = vmov 0.0   ;;  %v38_v2 = vld [vmem:[#allocation4] sm:$0xff] }
  0x26   :  { %521 = vmatprep.subr.bf16.mxu0 %v633_v0  ;;  %455 = vmatprep.mubr.msk.f32.mxu0 %vm634_vm0, %v635_v1  ;;  %v39_v3 = vld [vmem:[#allocation4 + $0x8] sm:$0xff]  ;;  %v40_v4 = vld [vmem:[#allocation4 + $0x10] sm:$0xff]  ;;  %v41_v6 = vld [vmem:[#allocation4 + $0x18] sm:$0xff]  ;;  %vm47_vm1 = vcmask 588800   ;;  %s636_s1 = smov 1   ;;  %vm383_vm2 = vcmask 7168  }
  0x27   :  { %533 = vmatprep.subr.bf16.mxu1 %v633_v0  ;;  %476 = vmatprep.mubr.msk.f32.mxu1 %vm634_vm0, %v635_v1  ;;  %v522_v5 = vpack.c.bf16 %v39_v3, %v38_v2  ;;  %v525_v7 = vpack.c.bf16 %v41_v6, %v40_v4  ;;  %v42_v8 = vld [vmem:[#allocation4 + $0x20] sm:$0xff]  ;;  %v123_v9 = vld [vmem:[#allocation4 + $0x48] sm:$0xff]  ;;  %v124_v10 = vld [vmem:[#allocation4 + $0x50] sm:$0xff]  ;;  %vm385_vm3 = vcmask 15360  }
  0x28   :  { %v43_v11 = vld [vmem:[#allocation4 + $0x28] sm:$0xff]  ;;  %v534_v12 = vpack.c.bf16 %v124_v10, %v123_v9  ;;  %v125_v13 = vld [vmem:[#allocation4 + $0x58] sm:$0xff]  ;;  %v126_v14 = vld [vmem:[#allocation4 + $0x60] sm:$0xff] }
  0x29   :  { %523 = vmatpush3.bf16.msra.mxu0 %v522_v5  ;;  %v537_v15 = vpack.c.bf16 %v126_v14, %v125_v13  ;;  %v528_v16 = vpack.c.bf16 %v43_v11, %v42_v8  ;;  %v127_v17 = vld [vmem:[#allocation4 + $0x68] sm:$0xff]  ;;  %v128_v18 = vld [vmem:[#allocation4 + $0x70] sm:$0xff]  ;;  %v45_v20 = vld [vmem:[#allocation4 + $0x38] sm:$0xff] }
  0x2a   :  { %524 = vmatprep.subr.bf16.mxu0 %v633_v0  ;;  %535 = vmatpush3.bf16.msra.mxu1 %v534_v12  ;;  %v44_v19 = vld [vmem:[#allocation4 + $0x30] sm:$0xff]  ;;  %v540_v21 = vpack.c.bf16 %v128_v18, %v127_v17  ;;  %v129_v23 = vld [vmem:[#allocation4 + $0x78] sm:$0xff]  ;;  %v130_v24 = vld [vmem:[#allocation4 + $0x80] sm:$0xff] }
  0x2b   :  { %536 = vmatprep.subr.bf16.mxu1 %v633_v0  ;;  %v531_v22 = vpack.c.bf16 %v45_v20, %v44_v19  ;;  %v543_v25 = vpack.c.bf16 %v130_v24, %v129_v23  ;;  %v46_v26 = vld [vmem:[#allocation4 + $0x40] sm:$0xff]  ;;  %v37_v27 = vld [vmem:[#allocation2] sm:$0xff]  ;;  %v131_v28 = vld [vmem:[#allocation4 + $0x88] sm:$0xff] }
  0x2c   :  { %v207_v29 = vld [vmem:[#allocation4 + $0x90] sm:$0xff]  ;;  %v208_v30 = vld [vmem:[#allocation4 + $0x98] sm:$0xff]  ;;  %v209_v31 = vld [vmem:[#allocation4 + $0xa0] sm:$0xff] }
  0x2d   :  { %526 = vmatpush3.bf16.msra.mxu0 %v525_v7  ;;  %v546_v32 = vpack.c.bf16 %v208_v30, %v207_v29  ;;  %v210_v33 = vld [vmem:[#allocation4 + $0xa8] sm:$0xff]  ;;  %v211_v35 = vld [vmem:[#allocation4 + $0xb0] sm:$0xff]  ;;  %v212_v36 = vld [vmem:[#allocation4 + $0xb8] sm:$0xff] }
  0x2e   :  { %527 = vmatprep.subr.bf16.mxu0 %v633_v0  ;;  %538 = vmatpush3.bf16.msra.mxu1 %v537_v15  ;;  %v549_v34 = vpack.c.bf16 %v210_v33, %v209_v31  ;;  %v552_v37 = vpack.c.bf16 %v212_v36, %v211_v35  ;;  %v213_v38 = vld [vmem:[#allocation4 + $0xc0] sm:$0xff]  ;;  %v214_v39 = vld [vmem:[#allocation4 + $0xc8] sm:$0xff]  ;;  %v215_v44 = vld [vmem:[#allocation4 + $0xd0] sm:$0xff] }
  0x2f   :  { %539 = vmatprep.subr.bf16.mxu1 %v633_v0  ;;  %v555_v40 = vpack.c.bf16 %v214_v39, %v213_v38  ;;  %v291_v45 = vld [vmem:[#allocation4 + $0xd8] sm:$0xff]  ;;  %v292_v46 = vld [vmem:[#allocation4 + $0xe0] sm:$0xff]  ;;  %v293_v47 = vld [vmem:[#allocation4 + $0xe8] sm:$0xff] }
  0x30   :  { %v558_v48 = vpack.c.bf16 %v292_v46, %v291_v45  ;;  %v294_v49 = vld [vmem:[#allocation4 + $0xf0] sm:$0xff]  ;;  %v295_v51 = vld [vmem:[#allocation4 + $0xf8] sm:$0xff]  ;;  %v296_v52 = vld [vmem:[#allocation4 + $0x100] sm:$0xff] }
  0x31   :  { %529 = vmatpush3.bf16.msra.mxu0 %v528_v16  ;;  %v561_v50 = vpack.c.bf16 %v294_v49, %v293_v47  ;;  %v564_v53 = vpack.c.bf16 %v296_v52, %v295_v51  ;;  %v297_v54 = vld [vmem:[#allocation4 + $0x108] sm:$0xff]  ;;  %v298_v55 = vld [vmem:[#allocation4 + $0x110] sm:$0xff]  ;;  %v299_v60 = vld [vmem:[#allocation4 + $0x118] sm:$0xff] }
  0x32   :  { %530 = vmatprep.subr.bf16.mxu0 %v633_v0  ;;  %541 = vmatpush3.bf16.msra.mxu1 %v540_v21  ;;  %v567_v56 = vpack.c.bf16 %v298_v55, %v297_v54 }
  0x33   :  { %542 = vmatprep.subr.bf16.mxu1 %v633_v0 }
  0x35   :  { %532 = vmatpush3.bf16.msra.mxu0 %v531_v22 }
  0x36   :  { %453 = vmatprep.subr.mxu0 %v635_v1  ;;  %544 = vmatpush3.bf16.msra.mxu1 %v543_v25 }
  0x37   :  { %474 = vmatprep.subr.mxu1 %v635_v1 }
  0x39   :  { %454 = vmatpush3.msra.mxu0 %v46_v26 }
  0x3a   :  { %456 = vmatmul.mubr.msk.f32.vlgmr.msra.gmra.mrb[0].mxu0 %vm47_vm1, %v37_v27  ;;  %545 = vmatprep.subr.bf16.mxu0 %v633_v0 }
  0x3b   :  { %497 = vmatprep.mubr.msk.f32.mxu0 %vm634_vm0, %v635_v1  ;;  %475 = vmatpush3.msra.mxu1 %v131_v28 }
  0x3c   :  { %557 = vmatprep.subr.bf16.mxu1 %v633_v0  ;;  %547 = vmatpush3.bf16.msra.mxu0 %v546_v32 }
  0x3d   :  { %548 = vmatprep.subr.bf16.mxu0 %v633_v0 }
  0x40   :  { %550 = vmatpush3.bf16.msra.mxu0 %v549_v34 }
  0x41   :  { %551 = vmatprep.subr.bf16.mxu0 %v633_v0 }
  0x44   :  { %553 = vmatpush3.bf16.msra.mxu0 %v552_v37 }
  0x45   :  { %554 = vmatprep.subr.bf16.mxu0 %v633_v0 }
  0x48   :  { %556 = vmatpush3.bf16.msra.mxu0 %v555_v40 }
  0x49   :  { %495 = vmatprep.subr.mxu0 %v635_v1 }
  0x4c   :  { %496 = vmatpush3.msra.mxu0 %v215_v44 }
 0x10d   :  { %v117_v41 = vpop.f32.mrb[0].mxu0 }
 0x10e   :  { %v121_v42 = vmax.f32 %v117_v41, 0.0  ;;  %v457_v43 = vpop.f32.mrb[1].mxu0 }
 0x110   :  { %477 = vmatmul.mubr.msk.f32.vlgmr.msra.gmra.mrb[0].mxu1 %vm47_vm1, %v121_v42 }
 0x111   :  { %518 = vmatprep.mubr.msk.f32.mxu1 %vm634_vm0, %v635_v1  ;;  %559 = vmatpush3.bf16.msra.mxu1 %v558_v48 }
 0x112   :  { %560 = vmatprep.subr.bf16.mxu1 %v633_v0 }
 0x115   :  { %562 = vmatpush3.bf16.msra.mxu1 %v561_v50 }
 0x116   :  { %563 = vmatprep.subr.bf16.mxu1 %v633_v0 }
 0x119   :  { %565 = vmatpush3.bf16.msra.mxu1 %v564_v53 }
 0x11a   :  { %566 = vmatprep.subr.bf16.mxu1 %v633_v0 }
 0x11d   :  { %568 = vmatpush3.bf16.msra.mxu1 %v567_v56 }
 0x11e   :  { %516 = vmatprep.subr.mxu1 %v635_v1 }
 0x121   :  { %517 = vmatpush3.msra.mxu1 %v299_v60 }
 0x1e3   :  { %v201_v57 = vpop.f32.mrb[0].mxu1 }
 0x1e4   :  { %v205_v58 = vmax.f32 %v201_v57, 0.0  ;;  %v478_v59 = vpop.f32.mrb[1].mxu1 }
 0x1e6   :  { %498 = vmatmul.mubr.msk.f32.vlgmr.msra.gmra.mrb[2].mxu0 %vm47_vm1, %v205_v58 }
 0x2b9   :  { %v285_v61 = vpop.f32.mrb[2].mxu0 }
 0x2ba   :  { %v289_v62 = vmax.f32 %v285_v61, 0.0  ;;  %v499_v63 = vpop.f32.mrb[3].mxu0 }
 0x2bc   :  { %519 = vmatmul.mubr.msk.f32.vlgmr.msra.gmra.mrb[2].mxu1 %vm47_vm1, %v289_v62 }
 0x38f   :  { %v369_v2 = vpop.f32.mrb[2].mxu1 }
 0x390   :  { %v373_v3 = vsub.f32 0.0, %v369_v2  ;;  %v520_v4 = vpop.f32.mrb[3].mxu1 }
 0x392   :  { %v374_v5 = vmul.f32 1.442695, %v373_v3 }
 0x394   :  { %577 = vpow2.f32 %v374_v5 }
 0x39e   :  { %v578_v0 = vpop.eup %577 }
 0x39f   :  { %v376_v6 = vadd.f32 1.0, %v578_v0 }
 0x3a1   :  { %579 = vrcp.f32 %v376_v6 }
 0x3ab   :  { %v580_v1 = vpop.eup %579 }
 0x3ac   :  { %380 = vrot.lane.b32.xlu0 %v580_v1, %s636_s1  ;;  %v378_v7 = vsub.f32 1.0, %v580_v1 }
 0x41e   :  { %v381_v8 = vpop.permute.xlu0 %380 }
 0x41f   :  { %v384_v9 = vsel %vm383_vm2, %v378_v7, %v381_v8 }
 0x420   :  { %386 = vst.msk [vmem:[%s720_s2] sm:$0xff] %vm385_vm3, %v384_v9 }
 0x421   :  { %391 = vsyncpa [#allocation3], 1 }
 0x422   :  { %392 = vsyncpa [#allocation5], 1 }

</bundles_post_ra>
